<compile_context>
chip_gen: v6e
topology: v6e:2x2x1
jax: 0.10.0
libtpu: 0.0.40
codegen_flags: <defaults>
</compile_context>

<pallas_src>
import jax
import jax.numpy as jnp
from jax import lax
from jax.experimental import pallas as pl
from jax.experimental.pallas import tpu as pltpu


def _round_up(x, m):
    return ((x + m - 1) // m) * m


def _make_kernel(kh, kw, Wp, Cout_pad, Mout_pad):
    """Build the fused conv+BN+ReLU kernel for one image per grid step."""

    def kernel(x_ref, w_ref, shift_ref, o_ref):
        # x_ref:     (1, Cin_pad, L_pad)        bf16 flat zero-padded image
        # w_ref:     (kh*kw, Cout_pad, Cin_pad) bf16, BN scale folded in (resident)
        # shift_ref: (Cout_pad, 1)              f32 folded conv-bias + BN shift
        # o_ref:     (1, Cout_pad, Mout_pad)    lane-dense over Ho*Wp (+ junk cols)
        acc = None
        for t in range(kh * kw):
            i, j = divmod(t, kw)
            s = i * Wp + j                              # static lane shift of tap (i, j)
            x_t = x_ref[0, :, pl.ds(s, Mout_pad)]       # (Cin_pad, Mout_pad) bf16
            d = jnp.dot(w_ref[t], x_t, preferred_element_type=jnp.float32)
            acc = d if acc is None else acc + d
        y = acc + shift_ref[...]                        # f32 epilogue (v5e-safe)
        o_ref[0, :, :] = jnp.maximum(y, 0.0).astype(o_ref.dtype)

    return kernel


def basic_conv2d(x_nchw, weight, bias, bn_gamma, bn_beta, bn_mean, bn_var,
                 *, stride=1, padding=1, eps=1e-5,
                 mxu_dtype=jnp.bfloat16, out_dtype=None):
    """Conv2d(stride=1) + BatchNorm2d(eval) + ReLU with im2col fused in-kernel.

    x_nchw: [N, Cin, H, W] -> [N, Cout, Ho, Wo].
    """
    if stride != 1:
        raise NotImplementedError("fused BasicConv2d kernel supports stride=1 only")

    N, Cin, H, W = x_nchw.shape
    Cout, _, kh, kw = weight.shape
    if out_dtype is None:
        out_dtype = x_nchw.dtype

    Hp, Wp = H + 2 * padding, W + 2 * padding
    Ho, Wo = Hp - kh + 1, Wp - kw + 1
    assert Ho > 0 and Wo > 0

    # Sublane multiple for MXU operands: 16 for bf16 packing, 8 for f32.
    sub = 16 if jnp.dtype(mxu_dtype).itemsize == 2 else 8
    Cin_pad = _round_up(Cin, sub)
    Cout_pad = _round_up(Cout, sub)

    Mout = Ho * Wp                           # flat output incl. (Wp - Wo) junk columns
    Mout_pad = _round_up(Mout, 128)          # lane-dense output width
    halo = (kh - 1) * Wp + (kw - 1)          # largest tap shift
    L_pad = _round_up(max(Hp * Wp, Mout_pad + halo), 128)

    # ---- input: cast to bf16 FIRST, zero-pad spatially, flatten, pad (one pass) ----
    x_b = x_nchw.astype(mxu_dtype)
    x_pad = jnp.pad(x_b, ((0, 0), (0, 0), (padding, padding), (padding, padding)))
    x_flat = x_pad.reshape(N, Cin, Hp * Wp)
    x_flat = jnp.pad(x_flat, ((0, 0), (0, Cin_pad - Cin), (0, L_pad - Hp * Wp)))

    # ---- fold BN (eval) into weights / per-channel shift ----
    scale = bn_gamma / jnp.sqrt(bn_var + eps)                     # [Cout]
    shift = (bias - bn_mean) * scale + bn_beta                    # [Cout]
    w_fold = weight * scale[:, None, None, None]                  # [Cout, Cin, kh, kw]
    w_taps = jnp.transpose(w_fold, (2, 3, 0, 1)).reshape(kh * kw, Cout, Cin)
    w_taps = jnp.pad(w_taps, ((0, 0), (0, Cout_pad - Cout), (0, Cin_pad - Cin)))
    w_taps = w_taps.astype(mxu_dtype)                             # bf16 MXU operand
    shift_p = jnp.pad(shift, (0, Cout_pad - Cout)).reshape(Cout_pad, 1)
    shift_p = shift_p.astype(jnp.float32)

    kernel = _make_kernel(kh, kw, Wp, Cout_pad, Mout_pad)

    out3 = pl.pallas_call(
        kernel,
        out_shape=jax.ShapeDtypeStruct((N, Cout_pad, Mout_pad), out_dtype),
        grid_spec=pltpu.PrefetchScalarGridSpec(
            num_scalar_prefetch=0,
            grid=(N,),
            in_specs=[
                # one flat image per step
                pl.BlockSpec((1, Cin_pad, L_pad), lambda n: (n, 0, 0)),
                # resident, grid-invariant operands (constant index_map => no re-fetch)
                pl.BlockSpec((kh * kw, Cout_pad, Cin_pad), lambda n: (0, 0, 0)),
                pl.BlockSpec((Cout_pad, 1), lambda n: (0, 0)),
            ],
            out_specs=pl.BlockSpec((1, Cout_pad, Mout_pad), lambda n: (n, 0, 0)),
        ),
        compiler_params=pltpu.CompilerParams(
            dimension_semantics=("parallel",),
            # Per-step tiles are tiny (KBs even at CIFAR shapes); 32 MiB is safe
            # on v5e/v6e (128 MiB VMEM) and v7x (64 MiB per TC).
            vmem_limit_bytes=32 * 1024 * 1024,
        ),
    )(x_flat, w_taps, shift_p)

    # ---- already NCHW order: strip padded channels and junk width columns ----
    out = out3[:, :Cout, :Mout].reshape(N, Cout, Ho, Wp)[:, :, :, :Wo]
    return out


def _reference_f32(x, w, b, g, beta, mean, var, eps=1e-5):
    """Exact module semantics in f32: conv -> BN(eval) -> ReLU."""
    y = lax.conv_general_dilated(
        x, w, window_strides=(1, 1), padding=((1, 1), (1, 1)),
        dimension_numbers=("NCHW", "OIHW", "NCHW"),
        precision=lax.Precision.HIGHEST)
    y = y + b.reshape(1, -1, 1, 1)
    y = (y - mean.reshape(1, -1, 1, 1)) / jnp.sqrt(var.reshape(1, -1, 1, 1) + eps)
    y = y * g.reshape(1, -1, 1, 1) + beta.reshape(1, -1, 1, 1)
    return jnp.maximum(y, 0.0)


def _reference_bf16_fold(x, w, b, g, beta, mean, var, eps=1e-5):
    """Mirror of the kernel math (BN scale folded into bf16 weights, bf16 inputs,
    f32 accumulation) so the kernel can be checked at tight tolerance."""
    scale = g / jnp.sqrt(var + eps)
    shift = (b - mean) * scale + beta
    w_fold = (w * scale.reshape(-1, 1, 1, 1)).astype(jnp.bfloat16).astype(jnp.float32)
    x_b = x.astype(jnp.bfloat16).astype(jnp.float32)
    y = lax.conv_general_dilated(
        x_b, w_fold, window_strides=(1, 1), padding=((1, 1), (1, 1)),
        dimension_numbers=("NCHW", "OIHW", "NCHW"),
        precision=lax.Precision.HIGHEST)
    y = y + shift.reshape(1, -1, 1, 1)
    return jnp.maximum(y, 0.0)


if __name__ == "__main__":
    key = jax.random.PRNGKey(0)
    kx, kw, kb, kg, kbt, km, kv = jax.random.split(key, 7)

    # Small shapes consistent with the module: batch=2, Cin=4, 16x16, Cout=8, 3x3 conv.
    N, Cin, H, W = 2, 4, 16, 16
    Cout, kh, kw_sz = 8, 3, 3

    x = jax.random.normal(kx, (N, Cin, H, W), dtype=jnp.float32)
    weight = jax.random.normal(kw, (Cout, Cin, kh, kw_sz), dtype=jnp.float32) * 0.1
    bias = jax.random.normal(kb, (Cout,), dtype=jnp.float32) * 0.1
    bn_gamma = 1.0 + 0.1 * jax.random.normal(kg, (Cout,), dtype=jnp.float32)
    bn_beta = 0.1 * jax.random.normal(kbt, (Cout,), dtype=jnp.float32)
    bn_mean = 0.1 * jax.random.normal(km, (Cout,), dtype=jnp.float32)
    bn_var = jnp.abs(jax.random.normal(kv, (Cout,), dtype=jnp.float32)) + 0.5

    out = basic_conv2d(x, weight, bias, bn_gamma, bn_beta, bn_mean, bn_var,
                       stride=1, padding=1)
    out = jax.block_until_ready(out)
    assert out.shape == (N, Cout, H, W), out.shape

    # Tight check against an exact mirror of the kernel math (bf16 MXU operands).
    ref_bf16 = _reference_bf16_fold(x, weight, bias, bn_gamma, bn_beta, bn_mean, bn_var)
    err_tight = float(jnp.max(jnp.abs(out - ref_bf16)))
    assert jnp.allclose(out, ref_bf16, atol=2e-3, rtol=2e-3), err_tight

    # Loose check against the true f32 module semantics (bf16 MXU rounding only).
    ref_f32 = _reference_f32(x, weight, bias, bn_gamma, bn_beta, bn_mean, bn_var)
    err_loose = float(jnp.max(jnp.abs(out - ref_f32)))
    assert jnp.allclose(out, ref_f32, atol=1e-1, rtol=1e-1), err_loose

    print("KERNEL_OK")
</pallas_src>

<mosaic_0001>
module attributes {stable_mosaic.version = 11 : i64} {
  func.func @kernel(%arg0: i32, %arg1: memref<1x16x512xbf16, #tpu.memory_space<vmem>>, %arg2: memref<9x16x16xbf16, #tpu.memory_space<vmem>>, %arg3: memref<16x1xf32, #tpu.memory_space<vmem>>, %arg4: memref<1x16x384xf32, #tpu.memory_space<vmem>>) attributes {dimension_semantics = [#tpu.dimension_semantics<parallel>], iteration_bounds = array<i64: 2>, scalar_prefetch = 0 : i64, scratch_operands = 0 : i64, tpu.core_type = #tpu.core_type<tc>, window_params = [{transform_indices = @transform_0, window_bounds = array<i64: 1, 16, 512>}, {pipeline_mode = #tpu.pipeline_mode<synchronous>, transform_indices = @transform_1, window_bounds = array<i64: 9, 16, 16>}, {pipeline_mode = #tpu.pipeline_mode<synchronous>, transform_indices = @transform_2, window_bounds = array<i64: 16, 1>}, {transform_indices = @transform_3, window_bounds = array<i64: 1, 16, 384>}]} {
    %c0 = arith.constant 0 : index
    %c0_0 = arith.constant 0 : index
    %c0_1 = arith.constant 0 : index
    %0 = vector.load %arg1[%c0, %c0_0, %c0_1] : memref<1x16x512xbf16, #tpu.memory_space<vmem>>, vector<1x16x384xbf16>
    %1 = vector.shape_cast %0 : vector<1x16x384xbf16> to vector<16x384xbf16>
    %c0_2 = arith.constant 0 : index
    %c0_3 = arith.constant 0 : index
    %c0_4 = arith.constant 0 : index
    %2 = vector.load %arg2[%c0_2, %c0_3, %c0_4] : memref<9x16x16xbf16, #tpu.memory_space<vmem>>, vector<1x16x16xbf16>
    %3 = vector.shape_cast %2 : vector<1x16x16xbf16> to vector<16x16xbf16>
    %cst = arith.constant dense<0.000000e+00> : vector<16x384xf32>
    %4 = tpu.matmul %3, %1, %cst {dimension_numbers = #tpu.dot_dimension_numbers<[1], [0], [0], [1], [0, 0, 1, 1], [], []>} : vector<16x16xbf16>, vector<16x384xbf16>, vector<16x384xf32> -> vector<16x384xf32>
    %c0_5 = arith.constant 0 : index
    %c0_6 = arith.constant 0 : index
    %c1 = arith.constant 1 : index
    %5 = vector.load %arg1[%c0_5, %c0_6, %c1] : memref<1x16x512xbf16, #tpu.memory_space<vmem>>, vector<1x16x384xbf16>
    %6 = vector.shape_cast %5 : vector<1x16x384xbf16> to vector<16x384xbf16>
    %c1_7 = arith.constant 1 : index
    %c0_8 = arith.constant 0 : index
    %c0_9 = arith.constant 0 : index
    %7 = vector.load %arg2[%c1_7, %c0_8, %c0_9] : memref<9x16x16xbf16, #tpu.memory_space<vmem>>, vector<1x16x16xbf16>
    %8 = vector.shape_cast %7 : vector<1x16x16xbf16> to vector<16x16xbf16>
    %cst_10 = arith.constant dense<0.000000e+00> : vector<16x384xf32>
    %9 = tpu.matmul %8, %6, %cst_10 {dimension_numbers = #tpu.dot_dimension_numbers<[1], [0], [0], [1], [0, 0, 1, 1], [], []>} : vector<16x16xbf16>, vector<16x384xbf16>, vector<16x384xf32> -> vector<16x384xf32>
    %10 = arith.addf %4, %9 : vector<16x384xf32>
    %c0_11 = arith.constant 0 : index
    %c0_12 = arith.constant 0 : index
    %c2 = arith.constant 2 : index
    %11 = vector.load %arg1[%c0_11, %c0_12, %c2] : memref<1x16x512xbf16, #tpu.memory_space<vmem>>, vector<1x16x384xbf16>
    %12 = vector.shape_cast %11 : vector<1x16x384xbf16> to vector<16x384xbf16>
    %c2_13 = arith.constant 2 : index
    %c0_14 = arith.constant 0 : index
    %c0_15 = arith.constant 0 : index
    %13 = vector.load %arg2[%c2_13, %c0_14, %c0_15] : memref<9x16x16xbf16, #tpu.memory_space<vmem>>, vector<1x16x16xbf16>
    %14 = vector.shape_cast %13 : vector<1x16x16xbf16> to vector<16x16xbf16>
    %cst_16 = arith.constant dense<0.000000e+00> : vector<16x384xf32>
    %15 = tpu.matmul %14, %12, %cst_16 {dimension_numbers = #tpu.dot_dimension_numbers<[1], [0], [0], [1], [0, 0, 1, 1], [], []>} : vector<16x16xbf16>, vector<16x384xbf16>, vector<16x384xf32> -> vector<16x384xf32>
    %16 = arith.addf %10, %15 : vector<16x384xf32>
    %c0_17 = arith.constant 0 : index
    %c0_18 = arith.constant 0 : index
    %c18 = arith.constant 18 : index
    %17 = vector.load %arg1[%c0_17, %c0_18, %c18] : memref<1x16x512xbf16, #tpu.memory_space<vmem>>, vector<1x16x384xbf16>
    %18 = vector.shape_cast %17 : vector<1x16x384xbf16> to vector<16x384xbf16>
    %c3 = arith.constant 3 : index
    %c0_19 = arith.constant 0 : index
    %c0_20 = arith.constant 0 : index
    %19 = vector.load %arg2[%c3, %c0_19, %c0_20] : memref<9x16x16xbf16, #tpu.memory_space<vmem>>, vector<1x16x16xbf16>
    %20 = vector.shape_cast %19 : vector<1x16x16xbf16> to vector<16x16xbf16>
    %cst_21 = arith.constant dense<0.000000e+00> : vector<16x384xf32>
    %21 = tpu.matmul %20, %18, %cst_21 {dimension_numbers = #tpu.dot_dimension_numbers<[1], [0], [0], [1], [0, 0, 1, 1], [], []>} : vector<16x16xbf16>, vector<16x384xbf16>, vector<16x384xf32> -> vector<16x384xf32>
    %22 = arith.addf %16, %21 : vector<16x384xf32>
    %c0_22 = arith.constant 0 : index
    %c0_23 = arith.constant 0 : index
    %c19 = arith.constant 19 : index
    %23 = vector.load %arg1[%c0_22, %c0_23, %c19] : memref<1x16x512xbf16, #tpu.memory_space<vmem>>, vector<1x16x384xbf16>
    %24 = vector.shape_cast %23 : vector<1x16x384xbf16> to vector<16x384xbf16>
    %c4 = arith.constant 4 : index
    %c0_24 = arith.constant 0 : index
    %c0_25 = arith.constant 0 : index
    %25 = vector.load %arg2[%c4, %c0_24, %c0_25] : memref<9x16x16xbf16, #tpu.memory_space<vmem>>, vector<1x16x16xbf16>
    %26 = vector.shape_cast %25 : vector<1x16x16xbf16> to vector<16x16xbf16>
    %cst_26 = arith.constant dense<0.000000e+00> : vector<16x384xf32>
    %27 = tpu.matmul %26, %24, %cst_26 {dimension_numbers = #tpu.dot_dimension_numbers<[1], [0], [0], [1], [0, 0, 1, 1], [], []>} : vector<16x16xbf16>, vector<16x384xbf16>, vector<16x384xf32> -> vector<16x384xf32>
    %28 = arith.addf %22, %27 : vector<16x384xf32>
    %c0_27 = arith.constant 0 : index
    %c0_28 = arith.constant 0 : index
    %c20 = arith.constant 20 : index
    %29 = vector.load %arg1[%c0_27, %c0_28, %c20] : memref<1x16x512xbf16, #tpu.memory_space<vmem>>, vector<1x16x384xbf16>
    %30 = vector.shape_cast %29 : vector<1x16x384xbf16> to vector<16x384xbf16>
    %c5 = arith.constant 5 : index
    %c0_29 = arith.constant 0 : index
    %c0_30 = arith.constant 0 : index
    %31 = vector.load %arg2[%c5, %c0_29, %c0_30] : memref<9x16x16xbf16, #tpu.memory_space<vmem>>, vector<1x16x16xbf16>
    %32 = vector.shape_cast %31 : vector<1x16x16xbf16> to vector<16x16xbf16>
    %cst_31 = arith.constant dense<0.000000e+00> : vector<16x384xf32>
    %33 = tpu.matmul %32, %30, %cst_31 {dimension_numbers = #tpu.dot_dimension_numbers<[1], [0], [0], [1], [0, 0, 1, 1], [], []>} : vector<16x16xbf16>, vector<16x384xbf16>, vector<16x384xf32> -> vector<16x384xf32>
    %34 = arith.addf %28, %33 : vector<16x384xf32>
    %c0_32 = arith.constant 0 : index
    %c0_33 = arith.constant 0 : index
    %c36 = arith.constant 36 : index
    %35 = vector.load %arg1[%c0_32, %c0_33, %c36] : memref<1x16x512xbf16, #tpu.memory_space<vmem>>, vector<1x16x384xbf16>
    %36 = vector.shape_cast %35 : vector<1x16x384xbf16> to vector<16x384xbf16>
    %c6 = arith.constant 6 : index
    %c0_34 = arith.constant 0 : index
    %c0_35 = arith.constant 0 : index
    %37 = vector.load %arg2[%c6, %c0_34, %c0_35] : memref<9x16x16xbf16, #tpu.memory_space<vmem>>, vector<1x16x16xbf16>
    %38 = vector.shape_cast %37 : vector<1x16x16xbf16> to vector<16x16xbf16>
    %cst_36 = arith.constant dense<0.000000e+00> : vector<16x384xf32>
    %39 = tpu.matmul %38, %36, %cst_36 {dimension_numbers = #tpu.dot_dimension_numbers<[1], [0], [0], [1], [0, 0, 1, 1], [], []>} : vector<16x16xbf16>, vector<16x384xbf16>, vector<16x384xf32> -> vector<16x384xf32>
    %40 = arith.addf %34, %39 : vector<16x384xf32>
    %c0_37 = arith.constant 0 : index
    %c0_38 = arith.constant 0 : index
    %c37 = arith.constant 37 : index
    %41 = vector.load %arg1[%c0_37, %c0_38, %c37] : memref<1x16x512xbf16, #tpu.memory_space<vmem>>, vector<1x16x384xbf16>
    %42 = vector.shape_cast %41 : vector<1x16x384xbf16> to vector<16x384xbf16>
    %c7 = arith.constant 7 : index
    %c0_39 = arith.constant 0 : index
    %c0_40 = arith.constant 0 : index
    %43 = vector.load %arg2[%c7, %c0_39, %c0_40] : memref<9x16x16xbf16, #tpu.memory_space<vmem>>, vector<1x16x16xbf16>
    %44 = vector.shape_cast %43 : vector<1x16x16xbf16> to vector<16x16xbf16>
    %cst_41 = arith.constant dense<0.000000e+00> : vector<16x384xf32>
    %45 = tpu.matmul %44, %42, %cst_41 {dimension_numbers = #tpu.dot_dimension_numbers<[1], [0], [0], [1], [0, 0, 1, 1], [], []>} : vector<16x16xbf16>, vector<16x384xbf16>, vector<16x384xf32> -> vector<16x384xf32>
    %46 = arith.addf %40, %45 : vector<16x384xf32>
    %c0_42 = arith.constant 0 : index
    %c0_43 = arith.constant 0 : index
    %c38 = arith.constant 38 : index
    %47 = vector.load %arg1[%c0_42, %c0_43, %c38] : memref<1x16x512xbf16, #tpu.memory_space<vmem>>, vector<1x16x384xbf16>
    %48 = vector.shape_cast %47 : vector<1x16x384xbf16> to vector<16x384xbf16>
    %c8 = arith.constant 8 : index
    %c0_44 = arith.constant 0 : index
    %c0_45 = arith.constant 0 : index
    %49 = vector.load %arg2[%c8, %c0_44, %c0_45] : memref<9x16x16xbf16, #tpu.memory_space<vmem>>, vector<1x16x16xbf16>
    %50 = vector.shape_cast %49 : vector<1x16x16xbf16> to vector<16x16xbf16>
    %cst_46 = arith.constant dense<0.000000e+00> : vector<16x384xf32>
    %51 = tpu.matmul %50, %48, %cst_46 {dimension_numbers = #tpu.dot_dimension_numbers<[1], [0], [0], [1], [0, 0, 1, 1], [], []>} : vector<16x16xbf16>, vector<16x384xbf16>, vector<16x384xf32> -> vector<16x384xf32>
    %52 = arith.addf %46, %51 : vector<16x384xf32>
    %c0_47 = arith.constant 0 : index
    %c0_48 = arith.constant 0 : index
    %53 = vector.load %arg3[%c0_47, %c0_48] : memref<16x1xf32, #tpu.memory_space<vmem>>, vector<16x1xf32>
    %54 = vector.broadcast %53 : vector<16x1xf32> to vector<16x384xf32>
    %55 = arith.addf %52, %54 : vector<16x384xf32>
    %cst_49 = arith.constant 0.000000e+00 : f32
    %56 = vector.broadcast %cst_49 : f32 to vector<16x384xf32>
    %57 = arith.maximumf %55, %56 : vector<16x384xf32>
    %c0_50 = arith.constant 0 : index
    %c0_51 = arith.constant 0 : index
    %c0_52 = arith.constant 0 : index
    %58 = vector.load %arg4[%c0_50, %c0_51, %c0_52] : memref<1x16x384xf32, #tpu.memory_space<vmem>>, vector<1x16x384xf32>
    %59 = vector.shape_cast %58 : vector<1x16x384xf32> to vector<16x384xf32>
    %60 = vector.shape_cast %57 : vector<16x384xf32> to vector<1x16x384xf32>
    tpu.vector_store %arg4[%c0_50, %c0_51, %c0_52], %60 {strides = array<i32>} : memref<1x16x384xf32, #tpu.memory_space<vmem>>, vector<1x16x384xf32>,
    return
  }
  func.func @transform_0(%arg0: i32) -> (i32, i32, i32) {
    %c0_i32 = arith.constant 0 : i32
    %c0_i32_0 = arith.constant 0 : i32
    %c0_i32_1 = arith.constant 0 : i32
    return %arg0, %c0_i32, %c0_i32_0 : i32, i32, i32
  }
  func.func @transform_1(%arg0: i32) -> (i32, i32, i32) {
    %c0_i32 = arith.constant 0 : i32
    %c0_i32_0 = arith.constant 0 : i32
    %c0_i32_1 = arith.constant 0 : i32
    %c0_i32_2 = arith.constant 0 : i32
    return %c0_i32, %c0_i32_0, %c0_i32_1 : i32, i32, i32
  }
  func.func @transform_2(%arg0: i32) -> (i32, i32) {
    %c0_i32 = arith.constant 0 : i32
    %c0_i32_0 = arith.constant 0 : i32
    %c0_i32_1 = arith.constant 0 : i32
    return %c0_i32, %c0_i32_0 : i32, i32
  }
  func.func @transform_3(%arg0: i32) -> (i32, i32, i32) {
    %c0_i32 = arith.constant 0 : i32
    %c0_i32_0 = arith.constant 0 : i32
    %c0_i32_1 = arith.constant 0 : i32
    return %arg0, %c0_i32, %c0_i32_0 : i32, i32, i32
  }
}

</mosaic_0001>

<bundles_post_ra>
// kernel: tpu_custom_call.1
= control target key start
LH: loop header
LB: loop body
LE: loop exit
PB: predicated region body
PF: predicated region fallthrough
CT: control target
= control target key end

     0   :  { %8 = vsyncpa [#allocation3], 0  ;;  %s2057_s0 = inlined_call_operand.hbm [shape: bf16[2,16,512], index: 0, kind: input, shape index: {}]   ;;  %s2058_s1 = inlined_call_operand.hbm [shape: bf16[9,16,16], index: 1, kind: input, shape index: {}]   ;;  %s2059_s2 = inlined_call_operand.vmem [shape: f32[16,1], index: 2, kind: input, shape index: {}]   ;;  %s2060_s3 = inlined_call_operand.hbm [shape: f32[2,16,384], index: 3, kind: output, shape index: {}]  }
   0x1   :  { %10 = vsyncpa [#allocation3 + $0x1], 0 }
   0x2   :  { %11 = vsyncpa [#allocation6], 0 }
   0x3   :  { %12 = vsyncpa [#allocation4], 0 }
   0x4   :  { %14 = vsyncpa [#allocation4 + $0x1], 0  ;;  %s1767_s12 = smov 0   ;;  %s1769_s13 = smov 0  }
   0x5   :  { %s1771_s14 = smov 0   ;;  %s1773_s15 = smov 0  }
   0x6 LB: > { %s1788_s16 = sadd.s32 4294967295, %s1725_s15   ;;  %s1389_s17 = sadd.s32 4294967294, %s1725_s15   ;;  %s1725_s15 = sphi %s1773_s15, %s2082_s15   ;;  %s1721_s14 = sphi %s1771_s14, %s2081_s14   ;;  %s1717_s13 = sphi %s1769_s13, %s2080_s13   ;;  %s1713_s12 = sphi %s1767_s12, %s2079_s12  }
   0x7   : > { %p40_p0 = scmp.ne.s32.totalorder %s1717_s13, %s1713_s12  ;;  %p2061_p1 = scmp.eq.s32.totalorder %s1788_s16, 0 }
   0x8   : > { %p112_p3 = scmp.eq.s32.totalorder %s1389_s17, 1  ;;  %p1390_p5 = scmp.ge.s32.totalorder %s1725_s15, 1 }
   0x9   : > { %p1797_p4 = por %p2061_p1, %p40_p0  ;;  %p119_p7 = scmp.lt.s32.totalorder %s1725_s15, 3 }
   0xa   : > { %p1802_p6 = por %p112_p3, %p40_p0  ;;  %s1727_s21 = smov [#allocation5]  }
   0xb   : > { %s2065_s18 = scalar_select %p1797_p4, 1, 0 }
   0xc   : > { %s2066_s19 = scalar_select %p1802_p6, 1, 0 }
   0xd   : > { %p1807_p8 = pnand %p1390_p5, %p119_p7  ;;  %s131_s22 = sshll.u32 %s1727_s21, 4  ;;  %s132_s22 = int_to_ptr.vmem [resolvable:$true] %s131_s22 }
   0xe   : > { %s1821_s24 = sadd.s32 1, %s1725_s15   ;;  %s27_s25 = sadd.s32 1, %s1721_s14 }
   0xf   : > { %s2067_s20 = scalar_select %p1807_p8, 1, 0 }
  0x10   : > { %p1519_p9 = pneg %p1807_p8  ;;  %s24_s26 = ssub.s32 %s1725_s15, %s1821_s24 }
  0x11   : > { %s1614_s27 = scalar_lea.vmem %s132_s22, 1152  ;;  %p1622_p5 = scmp.lt.s32.totalorder %s132_s22, %s132_s22 }
  0x12   : > { %p1816_p11 = pnand %p1519_p9, %p2061_p1  ;;  %p1615_p13 = scmp.ne.s32.totalorder %s132_s22, %s1614_s27 }
  0x13   : > { %p1623_p7 = scmp.lt.s32.totalorder %s1614_s27, %s1614_s27 }
  0x14   : > { %p1605_p12 = pneg %p1816_p11 }
  0x15   : > { %p1624_p10 = por %p1623_p7, %p1622_p5 }
  0x16   : > { %p1617_p0 = pnand %p1615_p13, %p1605_p12 }
  0x18   : > { %p1618_p3 = pneg %p1617_p0 }
  0x1a   : > { %p1625_p2 = pnand %p1624_p10, %p1618_p3 }
  0x1c   : > { %1628 = shalt.err (!%p1625_p2)
}
  0x1d   : > { %s1728_s28 = smov 64   ;;  %s1729_s29 = smov 4  }
  0x1e   : > { %1522 = dma.hbm_to_vmem [thread:$0]  (!%p1816_p11), %s2058_s1, 1152, %s132_s22, [#allocation6], %s1728_s28, %s1728_s28, %s1729_s29  }
  0x1f   : > { %p25_p9 = scmp.eq.s32.totalorder %s24_s26, 0  ;;  %p34_p12 = scmp.ne.s32.totalorder %s1721_s14, %s1717_s13 }
  0x20   : > { %p35_p10 = scmp.eq.s32.totalorder %s1725_s15, 0  ;;  %p1532_p2 = scmp.lt.s32.totalorder %s1725_s15, 2 }
  0x21   : > { %s1838_s5 = scalar_select %p25_p9, %s1721_s14, %s27_s25  }
  0x22   : > { %p36_p13 = por %p35_p10, %p34_p12  ;;  %p2069_p0 = scmp.eq.s32.totalorder %s1788_s16, 1 }
  0x23   : > { %s148_s7 = sand.u32 1, %s1721_s14   ;;  %s1436_s8 = sshll.u32 %s1725_s15, 9 }
  0x24   : > { %p1842_p3 = por %p2069_p0, %p34_p12  ;;  %s1393_s9 = sshll.u32 %s148_s7, 5 }
  0x25   : > { %s1851_s17 = scalar_lea.hbm %s2057_s0, %s1436_s8  ;;  %s152_s21 = scalar_lea.vmem [#allocation2], %s1393_s9 }
  0x26   : > { %s2070_s6 = scalar_select %p1842_p3, 1, 0 }
  0x27   : > { %s159_s22 = sshll.u32 %s152_s21, 4  ;;  %p1853_p11 = pnand %p1532_p2, %p36_p13  ;;  %s1857_s22 = int_to_ptr.vmem [resolvable:$true] %s159_s22 }
  0x28   : > { %s1859_s25 = scalar_lea.sflag [#allocation3], %s148_s7  ;;  %s1629_s26 = scalar_lea.hbm %s1851_s17, 512 }
  0x29   : > { %p1630_p5 = scmp.ne.s32.totalorder %s1851_s17, %s1629_s26  ;;  %p1631_p7 = pneg %p1853_p11 }
  0x2a   : > { %s1634_s29 = scalar_lea.hbm %s2057_s0, 1024  ;;  %p1635_p10 = scmp.lt.s32.totalorder %s1851_s17, %s2057_s0 }
  0x2b   : > { %p1632_p9 = pnand %p1631_p7, %p1630_p5  ;;  %p1636_p2 = scmp.lt.s32.totalorder %s1634_s29, %s1629_s26 }
  0x2d   : > { %p1633_p12 = pneg %p1632_p9  ;;  %p1637_p13 = por %p1636_p2, %p1635_p10 }
  0x2f   : > { %p1638_p0 = pnand %p1637_p13, %p1633_p12 }
  0x31   : > { %1641 = shalt.err (!%p1638_p0)
}
  0x32   : > { %s1642_s7 = scalar_lea.vmem %s1857_s22, 512  ;;  %s1730_s8 = smov [#allocation2]  }
  0x33   : > { %p1643_p1 = scmp.ne.s32.totalorder %s1857_s22, %s1642_s7  ;;  %s1647_s9 = sshll.u32 %s1730_s8, 4  ;;  %s1648_s9 = int_to_ptr.vmem [resolvable:$false] %s1647_s9 }
  0x34   : > { %s1649_s10 = scalar_lea.vmem %s1648_s9, 1024  ;;  %p1650_p9 = scmp.lt.s32.totalorder %s1857_s22, %s1648_s9 }
  0x35   : > { %p1645_p6 = pnand %p1643_p1, %p1631_p7  ;;  %p1651_p3 = scmp.lt.s32.totalorder %s1649_s10, %s1642_s7 }
  0x37   : > { %p1646_p5 = pneg %p1645_p6  ;;  %p1652_p4 = por %p1651_p3, %p1650_p9 }
  0x39   : > { %p1653_p8 = pnand %p1652_p4, %p1646_p5 }
  0x3b   : > { %1656 = shalt.err (!%p1653_p8)
}
  0x3c   : > { %s1731_s11 = smov 256   ;;  %s1732_s21 = smov 16  }
  0x3d   : > { %1526 = dma.hbm_to_vmem [thread:$0]  (!%p1853_p11), %s1851_s17, 512, %s1857_s22, %s1859_s25, %s1731_s11, %s1731_s11, %s1732_s21  }
  0x3e   : > { %p2072_p1 = scmp.ne.s32.totalorder %s2067_s20, 0 }
  0x3f   : > { %s1883_s26 = sand.u32 (!%p2072_p1), 1, %s1717_s13   ;;  %p2073_p4 = scmp.ne.s32.totalorder (!%p2072_p1), %s2065_s18, 0 }
  0x40   : > { %171 = sbr.rel (%p2072_p1) target bundleno = 483 (0x1e3), region = 32  ;;  %s1397_s27 = sshll.u32 (!%p2072_p1), %s1883_s26, 5 }
  0x41   : > { %s174_s28 = scalar_lea.sflag (!%p2072_p1), [#allocation3], %s1883_s26  ;;  %s1887_s29 = scalar_lea.vmem (!%p2072_p1), [#allocation2], %s1397_s27 }
  0x45   : > { %1700 = dma.done.wait (%p2073_p4), %s174_s28, 512  }
  0x46   : > { %1702 = vsyncadd (%p2073_p4), %s174_s28, 4294966784  ;;  %p2074_p6 = scmp.eq.s32.totalorder %s1788_s16, 0 }
  0x48   : > { %1704 = dma.done.wait (%p2074_p6), [#allocation6], 1152   ;;  %p2075_p8 = pmov %p2074_p6 }
  0x49   : > { %v1733_v0 = vmov 0.0   ;;  %vm1734_vm0 = vmmov 0   ;;  %v1735_v1 = vmov 0   ;;  %v1904_v2 = vld [vmem:[%s1887_s29 + $0x4] ss:$16 sps:$4 sm:$0xff]   ;;  %s1736_s18 = smov 127  }
  0x4a   : > { %1706 = vsyncadd (%p2075_p8), [#allocation6], 4294966144  ;;  %1455 = vmatprep.subr.bf16.mxu1 %v1733_v0  ;;  %1457 = vmatprep.mubr.msk.bf16.mxu1 %vm1734_vm0, %v1733_v0  ;;  %v1907_v3 = vld [vmem:[%s1887_s29] ss:$16 sps:$4 sm:$0xff]   ;;  %v1590_v4 = vld [vmem:[%s1887_s29 + $0x8] ss:$16 sps:$4 sm:$0xff]  }
  0x4b   : > { %290 = vmatprep.mubr.bf16.mxu0 %v1735_v1  ;;  %1585 = vset.pattern.permute.xlu0 %v1735_v1  ;;  %v1592_v5 = vld [vmem:[%s1887_s29 + $0xc] ss:$16 sps:$4 sm:$0xff]   ;;  %s1737_s20 = smov 126   ;;  %s1738_s17 = smov 110   ;;  %v1262_v6 = vld [vmem:[%s2059_s2] sm:$0xff]  ;;  %vm247_vm1 = vcmask 1039360  }
  0x4c   : > { %1586 = vset.pattern.permute.xlu1 %v1735_v1  ;;  %241 = vrot.lane.b32.xlu0 %v1904_v2, %s1736_s18  ;;  %s1739_s22 = smov 109   ;;  %s1740_s23 = smov 108   ;;  %v1263_v7 = vld [vmem:[%s2059_s2 + $0x8] sm:$0xff]  ;;  %vm254_vm2 = vcmask 130048   ;;  %vm466_vm3 = vcmask 1031168   ;;  %v1595_v22 = vld [vmem:[#allocation5] sm:$0xff]  }
  0x4d   : > { %239 = vrot.lane.b32.xlu1 %v1907_v3, %s1736_s18  ;;  %s1741_s25 = smov 92   ;;  %s1742_s30 = smov 91   ;;  %v1593_v15 = vld [vmem:[#allocation5 + $0x8] sm:$0xff]   ;;  %vm582_vm4 = vcmask 900096   ;;  %v1596_v30 = vld [vmem:[#allocation5 + $0x10] sm:$0xff]   ;;  %vm698_vm5 = vcmask 891904  }
  0x4e   : > { %s1743_s4 = smov 90   ;;  %v1594_v16 = vld [vmem:[%s1887_s29 + $0x8] ss:$16 sps:$4 sm:$0xff]   ;;  %vm814_vm6 = vcmask 883712   ;;  %v1598_v46 = vld [vmem:[#allocation5 + $0x20] sm:$0xff]   ;;  %vm930_vm7 = vcmask 752640  }
  0x4f   : > { %v1597_v38 = vld [vmem:[#allocation5 + $0x18] sm:$0xff]   ;;  %v1599_v54 = vld [vmem:[#allocation5 + $0x28] sm:$0xff]   ;;  %vm1046_vm8 = vcmask 744448   ;;  %v1600_v62 = vld [vmem:[#allocation5 + $0x30] sm:$0xff]   ;;  %vm1162_vm9 = vcmask 736256   ;;  %s1509_s11 = smul.u32 48, %s1883_s26 }
  0x50   : > { %243 = vrot.lane.b32.xlu0 %v1590_v4, %s1736_s18  ;;  %s1510_s28 = smul.u32 768, %s1788_s16  ;;  %s1293_s16 = scalar_lea.sflag [#allocation4], %s1883_s26 }
  0x51   : > { %245 = vrot.lane.b32.xlu1 %v1592_v5, %s1736_s18  ;;  %s203_s21 = scalar_lea.vmem [#allocation7], %s1509_s11  ;;  %p2076_p11 = scmp.ne.s32.totalorder %s2070_s6, 0 }
  0x52   : > { %s1306_s27 = sshll.u32 %s203_s21, 4  ;;  %s2009_s27 = int_to_ptr.vmem [resolvable:$true] %s1306_s27 }
  0x54   : > { %460 = vrot.lane.b32.xlu0 %v1904_v2, %s1737_s20 }
  0x55   : > { %462 = vrot.lane.b32.xlu1 %v1590_v4, %s1737_s20 }
  0x58   : > { %458 = vrot.lane.b32.xlu0 %v1907_v3, %s1737_s20 }
  0x59   : > { %464 = vrot.lane.b32.xlu1 %v1592_v5, %s1737_s20  ;;  %s2014_s20 = scalar_lea.hbm %s2060_s3, %s1510_s28 }
  0x5c   : > { %576 = vrot.lane.b32.xlu0 %v1904_v2, %s1738_s17 }
  0x5d   : > { %578 = vrot.lane.b32.xlu1 %v1590_v4, %s1738_s17 }
  0x60   : > { %574 = vrot.lane.b32.xlu0 %v1907_v3, %s1738_s17 }
  0x61   : > { %580 = vrot.lane.b32.xlu1 %v1592_v5, %s1738_s17  ;;  %s1657_s17 = scalar_lea.vmem %s2009_s27, 768 }
  0x62   : > { %p1658_p3 = scmp.ne.s32.totalorder %s2009_s27, %s1657_s17 }
  0x64   : > { %692 = vrot.lane.b32.xlu0 %v1904_v2, %s1739_s22  ;;  %p1659_p7 = pnand %p1658_p3, %p2076_p11 }
  0x65   : > { %694 = vrot.lane.b32.xlu1 %v1590_v4, %s1739_s22 }
  0x66   : > { %p1660_p12 = pneg %p1659_p7 }
  0x68   : > { %690 = vrot.lane.b32.xlu0 %v1907_v3, %s1739_s22 }
  0x69   : > { %696 = vrot.lane.b32.xlu1 %v1592_v5, %s1739_s22  ;;  %s1744_s22 = smov [#allocation7]  }
  0x6c   : > { %808 = vrot.lane.b32.xlu0 %v1904_v2, %s1740_s23 }
  0x6d   : > { %810 = vrot.lane.b32.xlu1 %v1590_v4, %s1740_s23 }
  0x70   : > { %806 = vrot.lane.b32.xlu0 %v1907_v3, %s1740_s23 }
  0x71   : > { %812 = vrot.lane.b32.xlu1 %v1592_v5, %s1740_s23  ;;  %s1661_s23 = sshll.u32 %s1744_s22, 4  ;;  %s1662_s23 = int_to_ptr.vmem [resolvable:$false] %s1661_s23 }
  0x72   : > { %p1664_p10 = scmp.lt.s32.totalorder %s2009_s27, %s1662_s23 }
  0x74   : > { %924 = vrot.lane.b32.xlu0 %v1904_v2, %s1741_s25 }
  0x75   : > { %926 = vrot.lane.b32.xlu1 %v1590_v4, %s1741_s25 }
  0x78   : > { %922 = vrot.lane.b32.xlu0 %v1907_v3, %s1741_s25 }
  0x79   : > { %928 = vrot.lane.b32.xlu1 %v1592_v5, %s1741_s25  ;;  %s1663_s25 = scalar_lea.vmem %s1662_s23, 1536 }
  0x7a   : > { %p1665_p2 = scmp.lt.s32.totalorder %s1663_s25, %s1657_s17 }
  0x7c   : > { %1040 = vrot.lane.b32.xlu0 %v1904_v2, %s1742_s30  ;;  %p1666_p13 = por %p1665_p2, %p1664_p10 }
  0x7d   : > { %1042 = vrot.lane.b32.xlu1 %v1590_v4, %s1742_s30 }
  0x7e   : > { %p1667_p0 = pnand %p1666_p13, %p1660_p12 }
  0x80   : > { %1038 = vrot.lane.b32.xlu0 %v1907_v3, %s1742_s30 }
  0x81   : > { %1044 = vrot.lane.b32.xlu1 %v1592_v5, %s1742_s30 }
  0x84   : > { %1156 = vrot.lane.b32.xlu0 %v1904_v2, %s1743_s4 }
  0x85   : > { %1158 = vrot.lane.b32.xlu1 %v1590_v4, %s1743_s4 }
  0x88   : > { %1154 = vrot.lane.b32.xlu0 %v1907_v3, %s1743_s4 }
  0x89   : > { %1160 = vrot.lane.b32.xlu1 %v1592_v5, %s1743_s4 }
  0x8c   : > { %1266 = vperm.xlu0 %1585, %v1262_v6  }
  0x8d   : > { %1271 = vperm.xlu1 %1586, %v1263_v7  }
  0xbe   : > { %v242_v8 = vpop.permute.xlu0 %241 }
  0xbf   : > { %v240_v9 = vpop.permute.xlu1 %239 }
  0xc0   : > { %v248_v14 = vsel %vm247_vm1, %v240_v9, %v242_v8 }
  0xc2   : > { %v244_v10 = vpop.permute.xlu0 %243 }
  0xc3   : > { %v246_v11 = vpop.permute.xlu1 %245  ;;  %v249_v12 = vsel %vm247_vm1, %v242_v8, %v244_v10  ;;  %v1601_v8 = vld [vmem:[#allocation5 + $0x38] sm:$0xff]  }
  0xc4   : > { %272 = vmatprep.subr.bf16.mxu0 %v249_v12  ;;  %v250_v13 = vsel %vm247_vm1, %v244_v10, %v246_v11  ;;  %v1602_v11 = vld [vmem:[#allocation5 + $0x40] sm:$0xff]  }
  0xc5   : > { %1456 = vmatpush3.bf16.msra.mxu1 %v250_v13  ;;  %273 = vmatpush1.bf16.msra.mxu0 %v248_v14 }
  0xc6   : > { %v461_v17 = vpop.permute.xlu0 %460  ;;  %380 = vmatprep.subr.bf16.mxu0 %v1904_v2  ;;  %1461 = vmatprep.subr.bf16.mxu1 %v1733_v0 }
  0xc7   : > { %v463_v18 = vpop.permute.xlu1 %462 }
  0xc8   : > { %1458 = vmatmul.mubr.msk.bf16.vlgmr.msra.gmra.mxu1 %vm254_vm2, %v1593_v15  ;;  %1404 = vmatmul.mubr.msk.bf16.vlgmr.msra.gmra.mxu0 %vm254_vm2, %v1593_v15  ;;  %v468_v19 = vsel %vm466_vm3, %v461_v17, %v463_v18 }
  0xc9   : > { %381 = vmatpush1.bf16.msra.mxu0 %v1907_v3  ;;  %1462 = vmatpush3.bf16.msra.mxu1 %v1594_v16 }
  0xca   : > { %v459_v20 = vpop.permute.xlu0 %458  ;;  %490 = vmatprep.subr.bf16.mxu0 %v468_v19  ;;  %1463 = vmatprep.mubr.msk.bf16.mxu1 %vm1734_vm0, %v1733_v0 }
  0xcb   : > { %v465_v21 = vpop.permute.xlu1 %464  ;;  %1467 = vmatprep.subr.bf16.mxu1 %v1733_v0  ;;  %398 = vmatprep.mubr.bf16.mxu0 %v1735_v1  ;;  %v467_v23 = vsel %vm466_vm3, %v459_v20, %v461_v17 }
  0xcc   : > { %v469_v24 = vsel %vm466_vm3, %v463_v18, %v465_v21 }
  0xce   : > { %v577_v25 = vpop.permute.xlu0 %576 }
  0xcf   : > { %v579_v26 = vpop.permute.xlu1 %578 }
  0xd0   : > { %1464 = vmatmul.mubr.msk.bf16.vlgmr.msra.gmra.mxu1 %vm254_vm2, %v1595_v22  ;;  %1410 = vmatmul.mubr.msk.bf16.vlgmr.msra.gmra.mxu0 %vm254_vm2, %v1595_v22  ;;  %v584_v27 = vsel %vm582_vm4, %v577_v25, %v579_v26 }
  0xd1   : > { %1468 = vmatpush3.bf16.msra.mxu1 %v469_v24  ;;  %491 = vmatpush1.bf16.msra.mxu0 %v467_v23 }
  0xd2   : > { %v575_v28 = vpop.permute.xlu0 %574  ;;  %606 = vmatprep.subr.bf16.mxu0 %v584_v27  ;;  %1469 = vmatprep.mubr.msk.bf16.mxu1 %vm1734_vm0, %v1733_v0 }
  0xd3   : > { %v581_v29 = vpop.permute.xlu1 %580  ;;  %1473 = vmatprep.subr.bf16.mxu1 %v1733_v0  ;;  %508 = vmatprep.mubr.bf16.mxu0 %v1735_v1  ;;  %v583_v31 = vsel %vm582_vm4, %v575_v28, %v577_v25 }
  0xd4   : > { %v585_v32 = vsel %vm582_vm4, %v579_v26, %v581_v29 }
  0xd6   : > { %v693_v33 = vpop.permute.xlu0 %692 }
  0xd7   : > { %v695_v34 = vpop.permute.xlu1 %694 }
  0xd8   : > { %1470 = vmatmul.mubr.msk.bf16.vlgmr.msra.gmra.mxu1 %vm254_vm2, %v1596_v30  ;;  %1413 = vmatmul.mubr.msk.bf16.vlgmr.msra.gmra.mxu0 %vm254_vm2, %v1596_v30  ;;  %v700_v35 = vsel %vm698_vm5, %v693_v33, %v695_v34 }
  0xd9   : > { %1474 = vmatpush3.bf16.msra.mxu1 %v585_v32  ;;  %607 = vmatpush1.bf16.msra.mxu0 %v583_v31 }
  0xda   : > { %v691_v36 = vpop.permute.xlu0 %690  ;;  %722 = vmatprep.subr.bf16.mxu0 %v700_v35  ;;  %1475 = vmatprep.mubr.msk.bf16.mxu1 %vm1734_vm0, %v1733_v0 }
  0xdb   : > { %v697_v37 = vpop.permute.xlu1 %696  ;;  %1479 = vmatprep.subr.bf16.mxu1 %v1733_v0  ;;  %624 = vmatprep.mubr.bf16.mxu0 %v1735_v1  ;;  %v699_v39 = vsel %vm698_vm5, %v691_v36, %v693_v33 }
  0xdc   : > { %v701_v40 = vsel %vm698_vm5, %v695_v34, %v697_v37 }
  0xde   : > { %v809_v41 = vpop.permute.xlu0 %808 }
  0xdf   : > { %v811_v42 = vpop.permute.xlu1 %810 }
  0xe0   : > { %1476 = vmatmul.mubr.msk.bf16.vlgmr.msra.gmra.mxu1 %vm254_vm2, %v1597_v38  ;;  %1416 = vmatmul.mubr.msk.bf16.vlgmr.msra.gmra.mxu0 %vm254_vm2, %v1597_v38  ;;  %v816_v43 = vsel %vm814_vm6, %v809_v41, %v811_v42 }
  0xe1   : > { %1480 = vmatpush3.bf16.msra.mxu1 %v701_v40  ;;  %723 = vmatpush1.bf16.msra.mxu0 %v699_v39 }
  0xe2   : > { %v807_v44 = vpop.permute.xlu0 %806  ;;  %838 = vmatprep.subr.bf16.mxu0 %v816_v43  ;;  %1481 = vmatprep.mubr.msk.bf16.mxu1 %vm1734_vm0, %v1733_v0 }
  0xe3   : > { %v813_v45 = vpop.permute.xlu1 %812  ;;  %1485 = vmatprep.subr.bf16.mxu1 %v1733_v0  ;;  %740 = vmatprep.mubr.bf16.mxu0 %v1735_v1  ;;  %v815_v47 = vsel %vm814_vm6, %v807_v44, %v809_v41 }
  0xe4   : > { %v817_v48 = vsel %vm814_vm6, %v811_v42, %v813_v45 }
  0xe6   : > { %v925_v49 = vpop.permute.xlu0 %924 }
  0xe7   : > { %v927_v50 = vpop.permute.xlu1 %926 }
  0xe8   : > { %1482 = vmatmul.mubr.msk.bf16.vlgmr.msra.gmra.mxu1 %vm254_vm2, %v1598_v46  ;;  %1419 = vmatmul.mubr.msk.bf16.vlgmr.msra.gmra.mxu0 %vm254_vm2, %v1598_v46  ;;  %v932_v51 = vsel %vm930_vm7, %v925_v49, %v927_v50 }
  0xe9   : > { %1486 = vmatpush3.bf16.msra.mxu1 %v817_v48  ;;  %839 = vmatpush1.bf16.msra.mxu0 %v815_v47 }
  0xea   : > { %v923_v52 = vpop.permute.xlu0 %922  ;;  %954 = vmatprep.subr.bf16.mxu0 %v932_v51  ;;  %1487 = vmatprep.mubr.msk.bf16.mxu1 %vm1734_vm0, %v1733_v0 }
  0xeb   : > { %v929_v53 = vpop.permute.xlu1 %928  ;;  %1491 = vmatprep.subr.bf16.mxu1 %v1733_v0  ;;  %856 = vmatprep.mubr.bf16.mxu0 %v1735_v1  ;;  %v931_v55 = vsel %vm930_vm7, %v923_v52, %v925_v49 }
  0xec   : > { %v933_v56 = vsel %vm930_vm7, %v927_v50, %v929_v53 }
  0xee   : > { %v1041_v57 = vpop.permute.xlu0 %1040 }
  0xef   : > { %v1043_v58 = vpop.permute.xlu1 %1042 }
  0xf0   : > { %1488 = vmatmul.mubr.msk.bf16.vlgmr.msra.gmra.mxu1 %vm254_vm2, %v1599_v54  ;;  %1422 = vmatmul.mubr.msk.bf16.vlgmr.msra.gmra.mxu0 %vm254_vm2, %v1599_v54  ;;  %v1048_v59 = vsel %vm1046_vm8, %v1041_v57, %v1043_v58 }
  0xf1   : > { %1492 = vmatpush3.bf16.msra.mxu1 %v933_v56  ;;  %955 = vmatpush1.bf16.msra.mxu0 %v931_v55 }
  0xf2   : > { %v1039_v60 = vpop.permute.xlu0 %1038  ;;  %1070 = vmatprep.subr.bf16.mxu0 %v1048_v59  ;;  %1493 = vmatprep.mubr.msk.bf16.mxu1 %vm1734_vm0, %v1733_v0 }
  0xf3   : > { %v1045_v61 = vpop.permute.xlu1 %1044  ;;  %1497 = vmatprep.subr.bf16.mxu1 %v1733_v0  ;;  %972 = vmatprep.mubr.bf16.mxu0 %v1735_v1  ;;  %v1047_v63 = vsel %vm1046_vm8, %v1039_v60, %v1041_v57 }
  0xf4   : > { %v1049_v2 = vsel %vm1046_vm8, %v1043_v58, %v1045_v61 }
  0xf6   : > { %v1157_v3 = vpop.permute.xlu0 %1156 }
  0xf7   : > { %v1159_v4 = vpop.permute.xlu1 %1158 }
  0xf8   : > { %1494 = vmatmul.mubr.msk.bf16.vlgmr.msra.gmra.mxu1 %vm254_vm2, %v1600_v62  ;;  %1425 = vmatmul.mubr.msk.bf16.vlgmr.msra.gmra.mxu0 %vm254_vm2, %v1600_v62  ;;  %v1164_v5 = vsel %vm1162_vm9, %v1157_v3, %v1159_v4 }
  0xf9   : > { %1498 = vmatpush3.bf16.msra.mxu1 %v1049_v2  ;;  %1071 = vmatpush1.bf16.msra.mxu0 %v1047_v63 }
  0xfa   : > { %1186 = vmatprep.subr.bf16.mxu0 %v1164_v5  ;;  %1499 = vmatprep.mubr.msk.bf16.mxu1 %vm1734_vm0, %v1733_v0  ;;  %v1155_v6 = vpop.permute.xlu0 %1154 }
  0xfb   : > { %v1161_v7 = vpop.permute.xlu1 %1160  ;;  %1503 = vmatprep.subr.bf16.mxu1 %v1733_v0  ;;  %1088 = vmatprep.mubr.bf16.mxu0 %v1735_v1  ;;  %v1163_v9 = vsel %vm1162_vm9, %v1155_v6, %v1157_v3 }
  0xfc   : > { %v1165_v10 = vsel %vm1162_vm9, %v1159_v4, %v1161_v7 }
 0x100   : > { %1500 = vmatmul.mubr.msk.bf16.vlgmr.msra.gmra.mxu1 %vm254_vm2, %v1601_v8  ;;  %1428 = vmatmul.mubr.msk.bf16.vlgmr.msra.gmra.mxu0 %vm254_vm2, %v1601_v8 }
 0x101   : > { %1504 = vmatpush3.bf16.msra.mxu1 %v1165_v10  ;;  %1187 = vmatpush1.bf16.msra.mxu0 %v1163_v9 }
 0x102   : > { %1505 = vmatprep.mubr.msk.bf16.mxu1 %vm1734_vm0, %v1733_v0  ;;  %1204 = vmatprep.mubr.bf16.mxu0 %v1735_v1 }
 0x108   : > { %1506 = vmatmul.mubr.msk.bf16.vlgmr.msra.gmra.mxu1 %vm254_vm2, %v1602_v11  ;;  %1431 = vmatmul.mubr.msk.bf16.vlgmr.msra.gmra.mxu0 %vm254_vm2, %v1602_v11 }
 0x188   : > { %v335_v12 = vpop.f32.mrf.mxu1  ;;  %v292_v13 = vpop.f32.mrf.mxu0 }
 0x18a   : > { %v1459_v14 = vpop.f32.mrf.mxu1  ;;  %v294_v15 = vpop.f32.mrf.mxu0 }
 0x18c   : > { %v338_v16 = vpop.f32.mrf.mxu1  ;;  %v296_v17 = vpop.f32.mrf.mxu0 }
 0x18e   : > { %v1460_v18 = vpop.f32.mrf.mxu1  ;;  %v298_v19 = vpop.f32.mrf.mxu0 }
 0x190   : > { %v443_v20 = vpop.f32.mrf.mxu1  ;;  %v400_v21 = vpop.f32.mrf.mxu0 }
 0x191   : > { %v444_v62 = vadd.f32 %v443_v20, %v335_v12  ;;  %v401_v63 = vadd.f32 %v400_v21, %v292_v13 }
 0x192   : > { %v1465_v22 = vpop.f32.mrf.mxu1  ;;  %v402_v23 = vpop.f32.mrf.mxu0 }
 0x193   : > { %v403_v4 = vadd.f32 %v402_v23, %v294_v15 }
 0x194   : > { %v446_v0 = vpop.f32.mrf.mxu1  ;;  %v404_v24 = vpop.f32.mrf.mxu0 }
 0x195   : > { %v447_v9 = vadd.f32 %v446_v0, %v338_v16  ;;  %v405_v18 = vadd.f32 %v404_v24, %v296_v17 }
 0x196   : > { %v1466_v1 = vpop.f32.mrf.mxu1  ;;  %v406_v25 = vpop.f32.mrf.mxu0 }
 0x197   : > { %v407_v22 = vadd.f32 %v406_v25, %v298_v19 }
 0x198   : > { %v553_v26 = vpop.f32.mrf.mxu1  ;;  %v510_v27 = vpop.f32.mrf.mxu0 }
 0x199   : > { %v562_v5 = vadd.f32 %v553_v26, %v444_v62  ;;  %v560_v6 = vadd.f32 %v510_v27, %v401_v63  ;;  %v1272_v62 = vpop.permute.xlu1 %1271 }
 0x19a   : > { %v1471_v28 = vpop.f32.mrf.mxu1  ;;  %v512_v29 = vpop.f32.mrf.mxu0 }
 0x19b   : > { %v561_v10 = vadd.f32 %v512_v29, %v403_v4 }
 0x19c   : > { %v556_v30 = vpop.f32.mrf.mxu1  ;;  %v514_v31 = vpop.f32.mrf.mxu0 }
 0x19d   : > { %v563_v13 = vadd.f32 %v514_v31, %v405_v18 }
 0x19e   : > { %v1472_v32 = vpop.f32.mrf.mxu1  ;;  %v516_v33 = vpop.f32.mrf.mxu0 }
 0x19f   : > { %v565_v32 = vadd.f32 %v556_v30, %v447_v9  ;;  %v564_v20 = vadd.f32 %v516_v33, %v407_v22 }
 0x1a0   : > { %v669_v34 = vpop.f32.mrf.mxu1  ;;  %v626_v35 = vpop.f32.mrf.mxu0 }
 0x1a1   : > { %v678_v11 = vadd.f32 %v669_v34, %v562_v5  ;;  %v676_v14 = vadd.f32 %v626_v35, %v560_v6 }
 0x1a2   : > { %v1477_v36 = vpop.f32.mrf.mxu1  ;;  %v628_v37 = vpop.f32.mrf.mxu0 }
 0x1a3   : > { %v677_v36 = vadd.f32 %v628_v37, %v561_v10 }
 0x1a4   : > { %v672_v38 = vpop.f32.mrf.mxu1  ;;  %v630_v39 = vpop.f32.mrf.mxu0 }
 0x1a5   : > { %v681_v23 = vadd.f32 %v672_v38, %v565_v32  ;;  %v679_v16 = vadd.f32 %v630_v39, %v563_v13 }
 0x1a6   : > { %v1478_v40 = vpop.f32.mrf.mxu1  ;;  %v632_v41 = vpop.f32.mrf.mxu0 }
 0x1a7   : > { %v680_v0 = vadd.f32 %v632_v41, %v564_v20 }
 0x1a8   : > { %v785_v42 = vpop.f32.mrf.mxu1  ;;  %v742_v43 = vpop.f32.mrf.mxu0 }
 0x1a9   : > { %v794_v40 = vadd.f32 %v785_v42, %v678_v11  ;;  %v792_v12 = vadd.f32 %v742_v43, %v676_v14 }
 0x1aa   : > { %v1483_v44 = vpop.f32.mrf.mxu1  ;;  %v744_v45 = vpop.f32.mrf.mxu0 }
 0x1ab   : > { %v793_v26 = vadd.f32 %v744_v45, %v677_v36  ;;  %v1267_v45 = vpop.permute.xlu0 %1266 }
 0x1ac   : > { %v788_v46 = vpop.f32.mrf.mxu1  ;;  %v746_v47 = vpop.f32.mrf.mxu0 }
 0x1ad   : > { %v797_v17 = vadd.f32 %v788_v46, %v681_v23  ;;  %v795_v30 = vadd.f32 %v746_v47, %v679_v16 }
 0x1ae   : > { %v1484_v48 = vpop.f32.mrf.mxu1  ;;  %v748_v49 = vpop.f32.mrf.mxu0 }
 0x1af   : > { %v796_v35 = vadd.f32 %v748_v49, %v680_v0 }
 0x1b0   : > { %v901_v50 = vpop.f32.mrf.mxu1  ;;  %v858_v51 = vpop.f32.mrf.mxu0 }
 0x1b1   : > { %v910_v27 = vadd.f32 %v901_v50, %v794_v40  ;;  %v908_v44 = vadd.f32 %v858_v51, %v792_v12 }
 0x1b2   : > { %v1489_v52 = vpop.f32.mrf.mxu1  ;;  %v860_v53 = vpop.f32.mrf.mxu0 }
 0x1b3   : > { %v909_v19 = vadd.f32 %v860_v53, %v793_v26 }
 0x1b4   : > { %v904_v54 = vpop.f32.mrf.mxu1  ;;  %v862_v55 = vpop.f32.mrf.mxu0 }
 0x1b5   : > { %v913_v33 = vadd.f32 %v904_v54, %v797_v17  ;;  %v911_v48 = vadd.f32 %v862_v55, %v795_v30 }
 0x1b6   : > { %v1490_v56 = vpop.f32.mrf.mxu1  ;;  %v864_v57 = vpop.f32.mrf.mxu0 }
 0x1b7   : > { %v912_v50 = vadd.f32 %v864_v57, %v796_v35 }
 0x1b8   : > { %v1017_v58 = vpop.f32.mrf.mxu1  ;;  %v974_v59 = vpop.f32.mrf.mxu0 }
 0x1b9   : > { %v1026_v24 = vadd.f32 %v1017_v58, %v910_v27  ;;  %v1024_v25 = vadd.f32 %v974_v59, %v908_v44 }
 0x1ba   : > { %v1495_v60 = vpop.f32.mrf.mxu1  ;;  %v976_v61 = vpop.f32.mrf.mxu0 }
 0x1bb   : > { %v1025_v42 = vadd.f32 %v976_v61, %v909_v19 }
 0x1bc   : > { %v1020_v2 = vpop.f32.mrf.mxu1  ;;  %v978_v3 = vpop.f32.mrf.mxu0 }
 0x1bd   : > { %v1029_v51 = vadd.f32 %v1020_v2, %v913_v33  ;;  %v1027_v56 = vadd.f32 %v978_v3, %v911_v48 }
 0x1be   : > { %v1496_v7 = vpop.f32.mrf.mxu1  ;;  %v980_v8 = vpop.f32.mrf.mxu0 }
 0x1bf   : > { %v1028_v58 = vadd.f32 %v980_v8, %v912_v50 }
 0x1c0   : > { %v1133_v1 = vpop.f32.mrf.mxu1  ;;  %v1090_v28 = vpop.f32.mrf.mxu0 }
 0x1c1   : > { %v1142_v43 = vadd.f32 %v1133_v1, %v1026_v24  ;;  %v1140_v38 = vadd.f32 %v1090_v28, %v1024_v25 }
 0x1c2   : > { %v1501_v21 = vpop.f32.mrf.mxu1  ;;  %v1092_v15 = vpop.f32.mrf.mxu0 }
 0x1c3   : > { %v1141_v46 = vadd.f32 %v1092_v15, %v1025_v42 }
 0x1c4   : > { %v1136_v29 = vpop.f32.mrf.mxu1  ;;  %v1094_v34 = vpop.f32.mrf.mxu0 }
 0x1c5   : > { %v1145_v59 = vadd.f32 %v1136_v29, %v1029_v51  ;;  %v1143_v63 = vadd.f32 %v1094_v34, %v1027_v56 }
 0x1c6   : > { %v1502_v37 = vpop.f32.mrf.mxu1  ;;  %v1096_v31 = vpop.f32.mrf.mxu0 }
 0x1c7   : > { %v1144_v4 = vadd.f32 %v1096_v31, %v1028_v58 }
 0x1c8   : > { %v1249_v39 = vpop.f32.mrf.mxu1  ;;  %v1206_v41 = vpop.f32.mrf.mxu0 }
 0x1c9   : > { %v1258_v52 = vadd.f32 %v1249_v39, %v1142_v43  ;;  %v1256_v53 = vadd.f32 %v1206_v41, %v1140_v38 }
 0x1ca   : > { %v1507_v47 = vpop.f32.mrf.mxu1  ;;  %v1208_v49 = vpop.f32.mrf.mxu0 }
 0x1cb   : > { %v1274_v60 = vadd.f32 %v1267_v45, %v1256_v53  ;;  %v1276_v54 = vadd.f32 %v1267_v45, %v1258_v52  ;;  %v1257_v61 = vadd.f32 %v1208_v49, %v1141_v46 }
 0x1cc   : > { %v1252_v55 = vpop.f32.mrf.mxu1  ;;  %v1210_v57 = vpop.f32.mrf.mxu0 }
 0x1cd   : > { %v1280_v5 = vmax.f32 %v1274_v60, 0.0  ;;  %v1282_v6 = vmax.f32 %v1276_v54, 0.0  ;;  %v1275_v2 = vadd.f32 %v1267_v45, %v1257_v61  ;;  %v1261_v7 = vadd.f32 %v1252_v55, %v1145_v59 }
 0x1ce   : > { %v1259_v3 = vadd.f32 %v1210_v57, %v1143_v63  ;;  %v1508_v8 = vpop.f32.mrf.mxu1  ;;  %v1212_v9 = vpop.f32.mrf.mxu0 }
 0x1cf   : > { %1286 = vst [vmem:[%s203_s21] sm:$0xff] %v1280_v5  ;;  %1288 = vst [vmem:[%s203_s21 + $0x10] sm:$0xff] %v1282_v6  ;;  %v1281_v10 = vmax.f32 %v1275_v2, 0.0  ;;  %v1279_v11 = vadd.f32 %v1272_v62, %v1261_v7  ;;  %v1260_v14 = vadd.f32 %v1212_v9, %v1144_v4 }
 0x1d0   : > { %v1277_v18 = vadd.f32 %v1272_v62, %v1259_v3 }
 0x1d1   : > { %1287 = vst [vmem:[%s203_s21 + $0x8] sm:$0xff] %v1281_v10  ;;  %v1285_v22 = vmax.f32 %v1279_v11, 0.0  ;;  %v1278_v1 = vadd.f32 %v1272_v62, %v1260_v14 }
 0x1d2   : > { %v1283_v28 = vmax.f32 %v1277_v18, 0.0 }
 0x1d3   : > { %1291 = vst [vmem:[%s203_s21 + $0x28] sm:$0xff] %v1285_v22  ;;  %v1284_v32 = vmax.f32 %v1278_v1, 0.0 }
 0x1d4   : > { %1289 = vst [vmem:[%s203_s21 + $0x18] sm:$0xff] %v1283_v28 }
 0x1d5   : > { %1290 = vst [vmem:[%s203_s21 + $0x20] sm:$0xff] %v1284_v32 }
 0x1d6   : > { %1670 = shalt.err (!%p1667_p0)
}
 0x1d7   : > { %s1671_s30 = scalar_lea.hbm %s2014_s20, 768  ;;  %s1675_s8 = scalar_lea.hbm %s2060_s3, 1536 }
 0x1d8   : > { %p1672_p5 = scmp.ne.s32.totalorder %s2014_s20, %s1671_s30  ;;  %p1676_p4 = scmp.lt.s32.totalorder %s2014_s20, %s2060_s3 }
 0x1d9   : > { %p1677_p6 = scmp.lt.s32.totalorder %s1675_s8, %s1671_s30 }
 0x1da   : > { %p1673_p9 = pnand %p1672_p5, %p2076_p11 }
 0x1db   : > { %p1678_p8 = por %p1677_p6, %p1676_p4 }
 0x1dc   : > { %p1674_p1 = pneg %p1673_p9 }
 0x1de   : > { %p1679_p3 = pnand %p1678_p8, %p1674_p1 }
 0x1e0   : > { %1682 = shalt.err (!%p1679_p3)
}
 0x1e1   : > { %s1745_s11 = smov 384   ;;  %s1746_s21 = smov 24  }
 0x1e2   : > { %1517 = dma.vmem_to_hbm [thread:$0]  (%p2076_p11), %s2009_s27, 768, %s2014_s20, %s1293_s16, %s1745_s11, %s1745_s11, %s1746_s21  }
 0x1e3 PF: > { %s1321_s28 = sand.u32 1, %s1713_s12   ;;  %p2077_p7 = scmp.ne.s32.totalorder %s2066_s19, 0 }
 0x1e4   : > { %p2078_p12 = scmp.ge.s32.totalorder %s1725_s15, 2  ;;  %s1322_s29 = scalar_lea.sflag [#allocation4], %s1321_s28 }
 0x1e6   : > { %p1528_p10 = pnand %p2078_p12, %p2077_p7 }
 0x1e8   : > { %p1529_p2 = pneg %p1528_p10 }
 0x1ea   : > { %1708 = dma.done.wait (%p1529_p2), %s1322_s29, 768  }
 0x1eb   : > { %1710 = vsyncadd (%p1529_p2), %s1322_s29, 4294966528  ;;  %p17_p13 = scmp.ge.s32.totalorder %s1821_s24, 4   ;;  %s2079_s12 = smov %s1717_s13 }
 0x1ec   : > { %s2080_s13 = smov %s1721_s14  ;;  %s2081_s14 = smov %s1838_s5 }
 0x1ed   : > { %s2082_s15 = smov %s1821_s24  ;;  %19 = sbr.rel (!%p17_p13) target bundleno = 6 (0x6), region = 89 }
 0x1f2   :  { %1327 = vsyncpa [#allocation3], 1 }
 0x1f3   :  { %1329 = vsyncpa [#allocation3 + $0x1], 1 }
 0x1f4   :  { %1330 = vsyncpa [#allocation6], 1 }
 0x1f5   :  { %1331 = vsyncpa [#allocation4], 1 }
 0x1f6   :  { %1333 = vsyncpa [#allocation4 + $0x1], 1 }

</bundles_post_ra>
